<compile_context>
chip_gen: v7x
topology: tpu7x:2x2x1
jax: 0.10.0
libtpu: 0.0.40
codegen_flags: <defaults>
</compile_context>

<pallas_src>
import functools

import numpy as np
import jax
import jax.numpy as jnp
from jax.experimental import pallas as pl
from jax.experimental.pallas import tpu as pltpu

COS_EPS = 1e-8  # torch.nn.functional.cosine_similarity default eps


# ------------------------------ Pallas kernel ------------------------------ #
def _normal_consistency_kernel(packed_ref, out_ref, dot_acc, n1_acc, n2_acc):
    """One E-tile of the fused edge-vector / cross-product / cosine loss.

    packed_ref : (4, 3, B, TILE_E) f32  [v0,v1,v2,v3] x coord x batch x edge
    out_ref    : (1, 1) f32             scalar loss (written on the last step)
    *_acc      : (3, B, TILE_E) f32     lane-wise partial sums of
                                        n1*n2, n1*n1, n2*n2 per (coord, batch)
    """
    t = pl.program_id(0)

    @pl.when(t == 0)
    def _init():
        dot_acc[...] = jnp.zeros_like(dot_acc)
        n1_acc[...] = jnp.zeros_like(n1_acc)
        n2_acc[...] = jnp.zeros_like(n2_acc)

    def comp(k, c):  # vertex-set k, coordinate c -> (B, TILE_E)
        return packed_ref[k, c, :, :]

    a1 = [comp(1, c) - comp(0, c) for c in range(3)]
    b1 = [comp(2, c) - comp(0, c) for c in range(3)]
    b2 = [comp(3, c) - comp(0, c) for c in range(3)]

    def cross(u, v):  # u x v, component lists of (B, TILE_E)
        return [u[1] * v[2] - u[2] * v[1],
                u[2] * v[0] - u[0] * v[2],
                u[0] * v[1] - u[1] * v[0]]

    n1 = cross(b1, a1)   # torch.cross(b1, a1)
    n2 = cross(a1, b2)   # torch.cross(a1, b2)

    for c in range(3):   # static unroll; pure lane-dense VPU work
        dot_acc[c, :, :] = dot_acc[c, :, :] + n1[c] * n2[c]
        n1_acc[c, :, :] = n1_acc[c, :, :] + n1[c] * n1[c]
        n2_acc[c, :, :] = n2_acc[c, :, :] + n2[c] * n2[c]

    @pl.when(t == pl.num_programs(0) - 1)
    def _finalize():
        dots = jnp.sum(dot_acc[...], axis=-1)           # (3, B)
        n1n = jnp.sqrt(jnp.sum(n1_acc[...], axis=-1))   # (3, B)
        n2n = jnp.sqrt(jnp.sum(n2_acc[...], axis=-1))   # (3, B)
        cos = dots / (jnp.maximum(n1n, COS_EPS) * jnp.maximum(n2n, COS_EPS))
        per = 1.0 - cos                                  # (3, B)
        total = jnp.sum(jnp.sum(per, axis=1, keepdims=True),
                        axis=0, keepdims=True)           # (1, 1)
        out_ref[...] = total


# ------------------------------- wrapper ----------------------------------- #
def normal_consistency_loss(vertices, v0s, v1s, v2s, v3s, *, max_tile_e=512):
    """vertices: (B, V, 3) float; v*s: (E,) int32 edge-adjacency indices."""
    vertices = vertices.astype(jnp.float32)
    B = vertices.shape[0]
    E = int(v0s.shape[0])

    # --- gather + pack (XLA glue; pure index plumbing) ---
    idx = jnp.concatenate([v0s, v1s, v2s, v3s], axis=0)          # (4E,)
    g = jnp.take(vertices, idx, axis=1)                          # (B, 4E, 3)
    g = g.reshape(B, 4, E, 3)
    packed = jnp.transpose(g, (1, 3, 0, 2))                      # (4, 3, B, E)

    # --- lane-dense padding / tiling of the edge axis ---
    e128 = ((E + 127) // 128) * 128
    tile_e = min(max_tile_e, e128)                               # multiple of 128
    e_pad = ((E + tile_e - 1) // tile_e) * tile_e
    packed = jnp.pad(packed, ((0, 0), (0, 0), (0, 0), (0, e_pad - E)))
    grid = (e_pad // tile_e,)

    flops = 4 * B * E * 45  # ~diffs + 2 crosses + 3 fused accumulations
    bytes_accessed = packed.size * 4 + 4

    out = pl.pallas_call(
        _normal_consistency_kernel,
        grid=grid,
        in_specs=[pl.BlockSpec((4, 3, B, tile_e), lambda t: (0, 0, 0, t))],
        out_specs=pl.BlockSpec((1, 1), lambda t: (0, 0)),
        out_shape=jax.ShapeDtypeStruct((1, 1), jnp.float32),
        scratch_shapes=[pltpu.VMEM((3, B, tile_e), jnp.float32)
                        for _ in range(3)],
        compiler_params=pltpu.CompilerParams(
            dimension_semantics=("arbitrary",),       # E axis is a reduction
            vmem_limit_bytes=32 * 1024 * 1024),
        cost_estimate=pl.CostEstimate(flops=flops, transcendentals=0,
                                      bytes_accessed=bytes_accessed),
    )(packed)
    return out[0, 0]


# ---------------------- __init__-equivalent preprocessing ------------------- #
def build_normal_consistency_indices(faces):
    """Replicates NormalConsistency.__init__ index construction (host NumPy)."""
    faces = np.asarray(faces)
    nf = faces.shape[0]
    vertices = list(set([tuple(v) for v in np.sort(
        np.concatenate((faces[:, 0:2], faces[:, 1:3]), axis=0))]))
    tmp = dict()
    for face in faces:
        f1 = np.sort(face[:2])
        f2 = np.sort(face[1:])
        f3 = np.sort(face[::2])
        k1 = int(f1[0] * nf + f1[1])
        k2 = int(f2[0] * nf + f2[1])
        k3 = int(f3[0] * nf + f3[1])
        tmp.setdefault(k1, []).append(face[2])
        tmp.setdefault(k2, []).append(face[0])
        tmp.setdefault(k3, []).append(face[1])
    v0s = np.array([v[0] for v in vertices], 'int32')
    v1s = np.array([v[1] for v in vertices], 'int32')
    v2s = np.array([tmp[int(v0) * nf + int(v1)][0]
                    for v0, v1 in zip(v0s, v1s)], 'int32')
    v3s = np.array([tmp[int(v0) * nf + int(v1)][1]
                    for v0, v1 in zip(v0s, v1s)], 'int32')
    return v0s, v1s, v2s, v3s


# ------------------------------ pure-JAX ref -------------------------------- #
def normal_consistency_ref(vertices, v0s, v1s, v2s, v3s):
    v0 = vertices[:, v0s, :]
    v1 = vertices[:, v1s, :]
    v2 = vertices[:, v2s, :]
    v3 = vertices[:, v3s, :]
    a1 = v1 - v0
    b1 = v2 - v0
    b2 = v3 - v0
    n1 = jnp.cross(b1, a1)   # last axis (size 3), same as torch.cross here
    n2 = jnp.cross(a1, b2)
    # F.cosine_similarity default dim=1 (edge axis), eps=1e-8
    dot = jnp.sum(n1 * n2, axis=1)
    n1n = jnp.maximum(jnp.sqrt(jnp.sum(n1 * n1, axis=1)), COS_EPS)
    n2n = jnp.maximum(jnp.sqrt(jnp.sum(n2 * n2, axis=1)), COS_EPS)
    return jnp.sum(1.0 - dot / (n1n * n2n))


# ---------------------------------- main ------------------------------------ #
if __name__ == "__main__":
    # Octahedron: 6 vertices, 8 faces, 12 unique edges.  A closed manifold is
    # required by the module's adjacency construction (each edge in 2 faces).
    faces = np.array([[0, 2, 4], [2, 1, 4], [1, 3, 4], [3, 0, 4],
                      [2, 0, 5], [1, 2, 5], [3, 1, 5], [0, 3, 5]], np.int32)
    v0s, v1s, v2s, v3s = build_normal_consistency_indices(faces)
    v0s, v1s, v2s, v3s = (jnp.asarray(a) for a in (v0s, v1s, v2s, v3s))

    batch, num_verts = 2, 6
    key = jax.random.PRNGKey(0)
    vertices = jax.random.normal(key, (batch, num_verts, 3), jnp.float32)

    loss_fn = jax.jit(normal_consistency_loss)
    loss = loss_fn(vertices, v0s, v1s, v2s, v3s)
    jax.block_until_ready(loss)

    ref = normal_consistency_ref(vertices, v0s, v1s, v2s, v3s)
    assert loss.shape == ()
    assert jnp.allclose(loss, ref, rtol=1e-4, atol=1e-4), (loss, ref)
    print("KERNEL_OK")
</pallas_src>

<mosaic_0001>
module attributes {stable_mosaic.version = 11 : i64} {
  func.func @_normal_consistency_kernel(%arg0: i32, %arg1: memref<4x3x2x128xf32, #tpu.memory_space<vmem>>, %arg2: memref<1x1xf32, #tpu.memory_space<vmem>>, %arg3: memref<3x2x128xf32, #tpu.memory_space<vmem>>, %arg4: memref<3x2x128xf32, #tpu.memory_space<vmem>>, %arg5: memref<3x2x128xf32, #tpu.memory_space<vmem>>) attributes {dimension_semantics = [#tpu.dimension_semantics<arbitrary>], iteration_bounds = array<i64: 1>, scalar_prefetch = 0 : i64, scratch_operands = 3 : i64, tpu.core_type = #tpu.core_type<tc>, window_params = [{transform_indices = @transform_0, window_bounds = array<i64: 4, 3, 2, 128>}, {pipeline_mode = #tpu.pipeline_mode<synchronous>, transform_indices = @transform_1, window_bounds = array<i64: 1, 1>}]} {
    %c0_i32 = arith.constant 0 : i32
    %0 = arith.cmpi eq, %arg0, %c0_i32 : i32
    %1 = arith.extui %0 : i1 to i32
    %c0_i32_0 = arith.constant 0 : i32
    %2 = arith.cmpi ne, %1, %c0_i32_0 : i32
    scf.if %2 {
      %cst = arith.constant 0.000000e+00 : f32
      %132 = vector.broadcast %cst : f32 to vector<3x2x128xf32>
      %c0_125 = arith.constant 0 : index
      %c0_126 = arith.constant 0 : index
      %c0_127 = arith.constant 0 : index
      %133 = vector.load %arg3[%c0_125, %c0_126, %c0_127] : memref<3x2x128xf32, #tpu.memory_space<vmem>>, vector<3x2x128xf32>
      tpu.vector_store %arg3[%c0_125, %c0_126, %c0_127], %132 {strides = array<i32>} : memref<3x2x128xf32, #tpu.memory_space<vmem>>, vector<3x2x128xf32>,
      %cst_128 = arith.constant 0.000000e+00 : f32
      %134 = vector.broadcast %cst_128 : f32 to vector<3x2x128xf32>
      %c0_129 = arith.constant 0 : index
      %c0_130 = arith.constant 0 : index
      %c0_131 = arith.constant 0 : index
      %135 = vector.load %arg4[%c0_129, %c0_130, %c0_131] : memref<3x2x128xf32, #tpu.memory_space<vmem>>, vector<3x2x128xf32>
      tpu.vector_store %arg4[%c0_129, %c0_130, %c0_131], %134 {strides = array<i32>} : memref<3x2x128xf32, #tpu.memory_space<vmem>>, vector<3x2x128xf32>,
      %cst_132 = arith.constant 0.000000e+00 : f32
      %136 = vector.broadcast %cst_132 : f32 to vector<3x2x128xf32>
      %c0_133 = arith.constant 0 : index
      %c0_134 = arith.constant 0 : index
      %c0_135 = arith.constant 0 : index
      %137 = vector.load %arg5[%c0_133, %c0_134, %c0_135] : memref<3x2x128xf32, #tpu.memory_space<vmem>>, vector<3x2x128xf32>
      tpu.vector_store %arg5[%c0_133, %c0_134, %c0_135], %136 {strides = array<i32>} : memref<3x2x128xf32, #tpu.memory_space<vmem>>, vector<3x2x128xf32>,
    } else {
    }
    %c1 = arith.constant 1 : index
    %c0 = arith.constant 0 : index
    %c0_1 = arith.constant 0 : index
    %c0_2 = arith.constant 0 : index
    %3 = vector.load %arg1[%c1, %c0, %c0_1, %c0_2] : memref<4x3x2x128xf32, #tpu.memory_space<vmem>>, vector<1x1x2x128xf32>
    %4 = vector.shape_cast %3 : vector<1x1x2x128xf32> to vector<2x128xf32>
    %c0_3 = arith.constant 0 : index
    %c0_4 = arith.constant 0 : index
    %c0_5 = arith.constant 0 : index
    %c0_6 = arith.constant 0 : index
    %5 = vector.load %arg1[%c0_3, %c0_4, %c0_5, %c0_6] : memref<4x3x2x128xf32, #tpu.memory_space<vmem>>, vector<1x1x2x128xf32>
    %6 = vector.shape_cast %5 : vector<1x1x2x128xf32> to vector<2x128xf32>
    %7 = arith.subf %4, %6 : vector<2x128xf32>
    %c1_7 = arith.constant 1 : index
    %c1_8 = arith.constant 1 : index
    %c0_9 = arith.constant 0 : index
    %c0_10 = arith.constant 0 : index
    %8 = vector.load %arg1[%c1_7, %c1_8, %c0_9, %c0_10] : memref<4x3x2x128xf32, #tpu.memory_space<vmem>>, vector<1x1x2x128xf32>
    %9 = vector.shape_cast %8 : vector<1x1x2x128xf32> to vector<2x128xf32>
    %c0_11 = arith.constant 0 : index
    %c1_12 = arith.constant 1 : index
    %c0_13 = arith.constant 0 : index
    %c0_14 = arith.constant 0 : index
    %10 = vector.load %arg1[%c0_11, %c1_12, %c0_13, %c0_14] : memref<4x3x2x128xf32, #tpu.memory_space<vmem>>, vector<1x1x2x128xf32>
    %11 = vector.shape_cast %10 : vector<1x1x2x128xf32> to vector<2x128xf32>
    %12 = arith.subf %9, %11 : vector<2x128xf32>
    %c1_15 = arith.constant 1 : index
    %c2 = arith.constant 2 : index
    %c0_16 = arith.constant 0 : index
    %c0_17 = arith.constant 0 : index
    %13 = vector.load %arg1[%c1_15, %c2, %c0_16, %c0_17] : memref<4x3x2x128xf32, #tpu.memory_space<vmem>>, vector<1x1x2x128xf32>
    %14 = vector.shape_cast %13 : vector<1x1x2x128xf32> to vector<2x128xf32>
    %c0_18 = arith.constant 0 : index
    %c2_19 = arith.constant 2 : index
    %c0_20 = arith.constant 0 : index
    %c0_21 = arith.constant 0 : index
    %15 = vector.load %arg1[%c0_18, %c2_19, %c0_20, %c0_21] : memref<4x3x2x128xf32, #tpu.memory_space<vmem>>, vector<1x1x2x128xf32>
    %16 = vector.shape_cast %15 : vector<1x1x2x128xf32> to vector<2x128xf32>
    %17 = arith.subf %14, %16 : vector<2x128xf32>
    %c2_22 = arith.constant 2 : index
    %c0_23 = arith.constant 0 : index
    %c0_24 = arith.constant 0 : index
    %c0_25 = arith.constant 0 : index
    %18 = vector.load %arg1[%c2_22, %c0_23, %c0_24, %c0_25] : memref<4x3x2x128xf32, #tpu.memory_space<vmem>>, vector<1x1x2x128xf32>
    %19 = vector.shape_cast %18 : vector<1x1x2x128xf32> to vector<2x128xf32>
    %c0_26 = arith.constant 0 : index
    %c0_27 = arith.constant 0 : index
    %c0_28 = arith.constant 0 : index
    %c0_29 = arith.constant 0 : index
    %20 = vector.load %arg1[%c0_26, %c0_27, %c0_28, %c0_29] : memref<4x3x2x128xf32, #tpu.memory_space<vmem>>, vector<1x1x2x128xf32>
    %21 = vector.shape_cast %20 : vector<1x1x2x128xf32> to vector<2x128xf32>
    %22 = arith.subf %19, %21 : vector<2x128xf32>
    %c2_30 = arith.constant 2 : index
    %c1_31 = arith.constant 1 : index
    %c0_32 = arith.constant 0 : index
    %c0_33 = arith.constant 0 : index
    %23 = vector.load %arg1[%c2_30, %c1_31, %c0_32, %c0_33] : memref<4x3x2x128xf32, #tpu.memory_space<vmem>>, vector<1x1x2x128xf32>
    %24 = vector.shape_cast %23 : vector<1x1x2x128xf32> to vector<2x128xf32>
    %c0_34 = arith.constant 0 : index
    %c1_35 = arith.constant 1 : index
    %c0_36 = arith.constant 0 : index
    %c0_37 = arith.constant 0 : index
    %25 = vector.load %arg1[%c0_34, %c1_35, %c0_36, %c0_37] : memref<4x3x2x128xf32, #tpu.memory_space<vmem>>, vector<1x1x2x128xf32>
    %26 = vector.shape_cast %25 : vector<1x1x2x128xf32> to vector<2x128xf32>
    %27 = arith.subf %24, %26 : vector<2x128xf32>
    %c2_38 = arith.constant 2 : index
    %c2_39 = arith.constant 2 : index
    %c0_40 = arith.constant 0 : index
    %c0_41 = arith.constant 0 : index
    %28 = vector.load %arg1[%c2_38, %c2_39, %c0_40, %c0_41] : memref<4x3x2x128xf32, #tpu.memory_space<vmem>>, vector<1x1x2x128xf32>
    %29 = vector.shape_cast %28 : vector<1x1x2x128xf32> to vector<2x128xf32>
    %c0_42 = arith.constant 0 : index
    %c2_43 = arith.constant 2 : index
    %c0_44 = arith.constant 0 : index
    %c0_45 = arith.constant 0 : index
    %30 = vector.load %arg1[%c0_42, %c2_43, %c0_44, %c0_45] : memref<4x3x2x128xf32, #tpu.memory_space<vmem>>, vector<1x1x2x128xf32>
    %31 = vector.shape_cast %30 : vector<1x1x2x128xf32> to vector<2x128xf32>
    %32 = arith.subf %29, %31 : vector<2x128xf32>
    %c3 = arith.constant 3 : index
    %c0_46 = arith.constant 0 : index
    %c0_47 = arith.constant 0 : index
    %c0_48 = arith.constant 0 : index
    %33 = vector.load %arg1[%c3, %c0_46, %c0_47, %c0_48] : memref<4x3x2x128xf32, #tpu.memory_space<vmem>>, vector<1x1x2x128xf32>
    %34 = vector.shape_cast %33 : vector<1x1x2x128xf32> to vector<2x128xf32>
    %c0_49 = arith.constant 0 : index
    %c0_50 = arith.constant 0 : index
    %c0_51 = arith.constant 0 : index
    %c0_52 = arith.constant 0 : index
    %35 = vector.load %arg1[%c0_49, %c0_50, %c0_51, %c0_52] : memref<4x3x2x128xf32, #tpu.memory_space<vmem>>, vector<1x1x2x128xf32>
    %36 = vector.shape_cast %35 : vector<1x1x2x128xf32> to vector<2x128xf32>
    %37 = arith.subf %34, %36 : vector<2x128xf32>
    %c3_53 = arith.constant 3 : index
    %c1_54 = arith.constant 1 : index
    %c0_55 = arith.constant 0 : index
    %c0_56 = arith.constant 0 : index
    %38 = vector.load %arg1[%c3_53, %c1_54, %c0_55, %c0_56] : memref<4x3x2x128xf32, #tpu.memory_space<vmem>>, vector<1x1x2x128xf32>
    %39 = vector.shape_cast %38 : vector<1x1x2x128xf32> to vector<2x128xf32>
    %c0_57 = arith.constant 0 : index
    %c1_58 = arith.constant 1 : index
    %c0_59 = arith.constant 0 : index
    %c0_60 = arith.constant 0 : index
    %40 = vector.load %arg1[%c0_57, %c1_58, %c0_59, %c0_60] : memref<4x3x2x128xf32, #tpu.memory_space<vmem>>, vector<1x1x2x128xf32>
    %41 = vector.shape_cast %40 : vector<1x1x2x128xf32> to vector<2x128xf32>
    %42 = arith.subf %39, %41 : vector<2x128xf32>
    %c3_61 = arith.constant 3 : index
    %c2_62 = arith.constant 2 : index
    %c0_63 = arith.constant 0 : index
    %c0_64 = arith.constant 0 : index
    %43 = vector.load %arg1[%c3_61, %c2_62, %c0_63, %c0_64] : memref<4x3x2x128xf32, #tpu.memory_space<vmem>>, vector<1x1x2x128xf32>
    %44 = vector.shape_cast %43 : vector<1x1x2x128xf32> to vector<2x128xf32>
    %c0_65 = arith.constant 0 : index
    %c2_66 = arith.constant 2 : index
    %c0_67 = arith.constant 0 : index
    %c0_68 = arith.constant 0 : index
    %45 = vector.load %arg1[%c0_65, %c2_66, %c0_67, %c0_68] : memref<4x3x2x128xf32, #tpu.memory_space<vmem>>, vector<1x1x2x128xf32>
    %46 = vector.shape_cast %45 : vector<1x1x2x128xf32> to vector<2x128xf32>
    %47 = arith.subf %44, %46 : vector<2x128xf32>
    %48 = arith.mulf %27, %17 : vector<2x128xf32>
    %49 = arith.mulf %32, %12 : vector<2x128xf32>
    %50 = arith.subf %48, %49 : vector<2x128xf32>
    %51 = arith.mulf %32, %7 : vector<2x128xf32>
    %52 = arith.mulf %22, %17 : vector<2x128xf32>
    %53 = arith.subf %51, %52 : vector<2x128xf32>
    %54 = arith.mulf %22, %12 : vector<2x128xf32>
    %55 = arith.mulf %27, %7 : vector<2x128xf32>
    %56 = arith.subf %54, %55 : vector<2x128xf32>
    %57 = arith.mulf %12, %47 : vector<2x128xf32>
    %58 = arith.mulf %17, %42 : vector<2x128xf32>
    %59 = arith.subf %57, %58 : vector<2x128xf32>
    %60 = arith.mulf %17, %37 : vector<2x128xf32>
    %61 = arith.mulf %7, %47 : vector<2x128xf32>
    %62 = arith.subf %60, %61 : vector<2x128xf32>
    %63 = arith.mulf %7, %42 : vector<2x128xf32>
    %64 = arith.mulf %12, %37 : vector<2x128xf32>
    %65 = arith.subf %63, %64 : vector<2x128xf32>
    %c0_69 = arith.constant 0 : index
    %c0_70 = arith.constant 0 : index
    %c0_71 = arith.constant 0 : index
    %66 = vector.load %arg3[%c0_69, %c0_70, %c0_71] : memref<3x2x128xf32, #tpu.memory_space<vmem>>, vector<1x2x128xf32>
    %67 = vector.shape_cast %66 : vector<1x2x128xf32> to vector<2x128xf32>
    %68 = arith.mulf %50, %59 : vector<2x128xf32>
    %69 = arith.addf %67, %68 : vector<2x128xf32>
    %c0_72 = arith.constant 0 : index
    %c0_73 = arith.constant 0 : index
    %c0_74 = arith.constant 0 : index
    %70 = vector.load %arg3[%c0_72, %c0_73, %c0_74] : memref<3x2x128xf32, #tpu.memory_space<vmem>>, vector<1x2x128xf32>
    %71 = vector.shape_cast %70 : vector<1x2x128xf32> to vector<2x128xf32>
    %72 = vector.shape_cast %69 : vector<2x128xf32> to vector<1x2x128xf32>
    tpu.vector_store %arg3[%c0_72, %c0_73, %c0_74], %72 {strides = array<i32>} : memref<3x2x128xf32, #tpu.memory_space<vmem>>, vector<1x2x128xf32>,
    %c0_75 = arith.constant 0 : index
    %c0_76 = arith.constant 0 : index
    %c0_77 = arith.constant 0 : index
    %73 = vector.load %arg4[%c0_75, %c0_76, %c0_77] : memref<3x2x128xf32, #tpu.memory_space<vmem>>, vector<1x2x128xf32>
    %74 = vector.shape_cast %73 : vector<1x2x128xf32> to vector<2x128xf32>
    %75 = arith.mulf %50, %50 : vector<2x128xf32>
    %76 = arith.addf %74, %75 : vector<2x128xf32>
    %c0_78 = arith.constant 0 : index
    %c0_79 = arith.constant 0 : index
    %c0_80 = arith.constant 0 : index
    %77 = vector.load %arg4[%c0_78, %c0_79, %c0_80] : memref<3x2x128xf32, #tpu.memory_space<vmem>>, vector<1x2x128xf32>
    %78 = vector.shape_cast %77 : vector<1x2x128xf32> to vector<2x128xf32>
    %79 = vector.shape_cast %76 : vector<2x128xf32> to vector<1x2x128xf32>
    tpu.vector_store %arg4[%c0_78, %c0_79, %c0_80], %79 {strides = array<i32>} : memref<3x2x128xf32, #tpu.memory_space<vmem>>, vector<1x2x128xf32>,
    %c0_81 = arith.constant 0 : index
    %c0_82 = arith.constant 0 : index
    %c0_83 = arith.constant 0 : index
    %80 = vector.load %arg5[%c0_81, %c0_82, %c0_83] : memref<3x2x128xf32, #tpu.memory_space<vmem>>, vector<1x2x128xf32>
    %81 = vector.shape_cast %80 : vector<1x2x128xf32> to vector<2x128xf32>
    %82 = arith.mulf %59, %59 : vector<2x128xf32>
    %83 = arith.addf %81, %82 : vector<2x128xf32>
    %c0_84 = arith.constant 0 : index
    %c0_85 = arith.constant 0 : index
    %c0_86 = arith.constant 0 : index
    %84 = vector.load %arg5[%c0_84, %c0_85, %c0_86] : memref<3x2x128xf32, #tpu.memory_space<vmem>>, vector<1x2x128xf32>
    %85 = vector.shape_cast %84 : vector<1x2x128xf32> to vector<2x128xf32>
    %86 = vector.shape_cast %83 : vector<2x128xf32> to vector<1x2x128xf32>
    tpu.vector_store %arg5[%c0_84, %c0_85, %c0_86], %86 {strides = array<i32>} : memref<3x2x128xf32, #tpu.memory_space<vmem>>, vector<1x2x128xf32>,
    %c1_87 = arith.constant 1 : index
    %c0_88 = arith.constant 0 : index
    %c0_89 = arith.constant 0 : index
    %87 = vector.load %arg3[%c1_87, %c0_88, %c0_89] : memref<3x2x128xf32, #tpu.memory_space<vmem>>, vector<1x2x128xf32>
    %88 = vector.shape_cast %87 : vector<1x2x128xf32> to vector<2x128xf32>
    %89 = arith.mulf %53, %62 : vector<2x128xf32>
    %90 = arith.addf %88, %89 : vector<2x128xf32>
    %c1_90 = arith.constant 1 : index
    %c0_91 = arith.constant 0 : index
    %c0_92 = arith.constant 0 : index
    %91 = vector.load %arg3[%c1_90, %c0_91, %c0_92] : memref<3x2x128xf32, #tpu.memory_space<vmem>>, vector<1x2x128xf32>
    %92 = vector.shape_cast %91 : vector<1x2x128xf32> to vector<2x128xf32>
    %93 = vector.shape_cast %90 : vector<2x128xf32> to vector<1x2x128xf32>
    tpu.vector_store %arg3[%c1_90, %c0_91, %c0_92], %93 {strides = array<i32>} : memref<3x2x128xf32, #tpu.memory_space<vmem>>, vector<1x2x128xf32>,
    %c1_93 = arith.constant 1 : index
    %c0_94 = arith.constant 0 : index
    %c0_95 = arith.constant 0 : index
    %94 = vector.load %arg4[%c1_93, %c0_94, %c0_95] : memref<3x2x128xf32, #tpu.memory_space<vmem>>, vector<1x2x128xf32>
    %95 = vector.shape_cast %94 : vector<1x2x128xf32> to vector<2x128xf32>
    %96 = arith.mulf %53, %53 : vector<2x128xf32>
    %97 = arith.addf %95, %96 : vector<2x128xf32>
    %c1_96 = arith.constant 1 : index
    %c0_97 = arith.constant 0 : index
    %c0_98 = arith.constant 0 : index
    %98 = vector.load %arg4[%c1_96, %c0_97, %c0_98] : memref<3x2x128xf32, #tpu.memory_space<vmem>>, vector<1x2x128xf32>
    %99 = vector.shape_cast %98 : vector<1x2x128xf32> to vector<2x128xf32>
    %100 = vector.shape_cast %97 : vector<2x128xf32> to vector<1x2x128xf32>
    tpu.vector_store %arg4[%c1_96, %c0_97, %c0_98], %100 {strides = array<i32>} : memref<3x2x128xf32, #tpu.memory_space<vmem>>, vector<1x2x128xf32>,
    %c1_99 = arith.constant 1 : index
    %c0_100 = arith.constant 0 : index
    %c0_101 = arith.constant 0 : index
    %101 = vector.load %arg5[%c1_99, %c0_100, %c0_101] : memref<3x2x128xf32, #tpu.memory_space<vmem>>, vector<1x2x128xf32>
    %102 = vector.shape_cast %101 : vector<1x2x128xf32> to vector<2x128xf32>
    %103 = arith.mulf %62, %62 : vector<2x128xf32>
    %104 = arith.addf %102, %103 : vector<2x128xf32>
    %c1_102 = arith.constant 1 : index
    %c0_103 = arith.constant 0 : index
    %c0_104 = arith.constant 0 : index
    %105 = vector.load %arg5[%c1_102, %c0_103, %c0_104] : memref<3x2x128xf32, #tpu.memory_space<vmem>>, vector<1x2x128xf32>
    %106 = vector.shape_cast %105 : vector<1x2x128xf32> to vector<2x128xf32>
    %107 = vector.shape_cast %104 : vector<2x128xf32> to vector<1x2x128xf32>
    tpu.vector_store %arg5[%c1_102, %c0_103, %c0_104], %107 {strides = array<i32>} : memref<3x2x128xf32, #tpu.memory_space<vmem>>, vector<1x2x128xf32>,
    %c2_105 = arith.constant 2 : index
    %c0_106 = arith.constant 0 : index
    %c0_107 = arith.constant 0 : index
    %108 = vector.load %arg3[%c2_105, %c0_106, %c0_107] : memref<3x2x128xf32, #tpu.memory_space<vmem>>, vector<1x2x128xf32>
    %109 = vector.shape_cast %108 : vector<1x2x128xf32> to vector<2x128xf32>
    %110 = arith.mulf %56, %65 : vector<2x128xf32>
    %111 = arith.addf %109, %110 : vector<2x128xf32>
    %c2_108 = arith.constant 2 : index
    %c0_109 = arith.constant 0 : index
    %c0_110 = arith.constant 0 : index
    %112 = vector.load %arg3[%c2_108, %c0_109, %c0_110] : memref<3x2x128xf32, #tpu.memory_space<vmem>>, vector<1x2x128xf32>
    %113 = vector.shape_cast %112 : vector<1x2x128xf32> to vector<2x128xf32>
    %114 = vector.shape_cast %111 : vector<2x128xf32> to vector<1x2x128xf32>
    tpu.vector_store %arg3[%c2_108, %c0_109, %c0_110], %114 {strides = array<i32>} : memref<3x2x128xf32, #tpu.memory_space<vmem>>, vector<1x2x128xf32>,
    %c2_111 = arith.constant 2 : index
    %c0_112 = arith.constant 0 : index
    %c0_113 = arith.constant 0 : index
    %115 = vector.load %arg4[%c2_111, %c0_112, %c0_113] : memref<3x2x128xf32, #tpu.memory_space<vmem>>, vector<1x2x128xf32>
    %116 = vector.shape_cast %115 : vector<1x2x128xf32> to vector<2x128xf32>
    %117 = arith.mulf %56, %56 : vector<2x128xf32>
    %118 = arith.addf %116, %117 : vector<2x128xf32>
    %c2_114 = arith.constant 2 : index
    %c0_115 = arith.constant 0 : index
    %c0_116 = arith.constant 0 : index
    %119 = vector.load %arg4[%c2_114, %c0_115, %c0_116] : memref<3x2x128xf32, #tpu.memory_space<vmem>>, vector<1x2x128xf32>
    %120 = vector.shape_cast %119 : vector<1x2x128xf32> to vector<2x128xf32>
    %121 = vector.shape_cast %118 : vector<2x128xf32> to vector<1x2x128xf32>
    tpu.vector_store %arg4[%c2_114, %c0_115, %c0_116], %121 {strides = array<i32>} : memref<3x2x128xf32, #tpu.memory_space<vmem>>, vector<1x2x128xf32>,
    %c2_117 = arith.constant 2 : index
    %c0_118 = arith.constant 0 : index
    %c0_119 = arith.constant 0 : index
    %122 = vector.load %arg5[%c2_117, %c0_118, %c0_119] : memref<3x2x128xf32, #tpu.memory_space<vmem>>, vector<1x2x128xf32>
    %123 = vector.shape_cast %122 : vector<1x2x128xf32> to vector<2x128xf32>
    %124 = arith.mulf %65, %65 : vector<2x128xf32>
    %125 = arith.addf %123, %124 : vector<2x128xf32>
    %c2_120 = arith.constant 2 : index
    %c0_121 = arith.constant 0 : index
    %c0_122 = arith.constant 0 : index
    %126 = vector.load %arg5[%c2_120, %c0_121, %c0_122] : memref<3x2x128xf32, #tpu.memory_space<vmem>>, vector<1x2x128xf32>
    %127 = vector.shape_cast %126 : vector<1x2x128xf32> to vector<2x128xf32>
    %128 = vector.shape_cast %125 : vector<2x128xf32> to vector<1x2x128xf32>
    tpu.vector_store %arg5[%c2_120, %c0_121, %c0_122], %128 {strides = array<i32>} : memref<3x2x128xf32, #tpu.memory_space<vmem>>, vector<1x2x128xf32>,
    %c0_i32_123 = arith.constant 0 : i32
    %129 = arith.cmpi eq, %arg0, %c0_i32_123 : i32
    %130 = arith.extui %129 : i1 to i32
    %c0_i32_124 = arith.constant 0 : i32
    %131 = arith.cmpi ne, %130, %c0_i32_124 : i32
    scf.if %131 {
      %c0_125 = arith.constant 0 : index
      %c0_126 = arith.constant 0 : index
      %c0_127 = arith.constant 0 : index
      %132 = vector.load %arg3[%c0_125, %c0_126, %c0_127] : memref<3x2x128xf32, #tpu.memory_space<vmem>>, vector<3x2x128xf32>
      %cst = arith.constant dense<0.000000e+00> : vector<3x2xf32>
      %133 = vector.multi_reduction <add>, %132, %cst [2] : vector<3x2x128xf32> to vector<3x2xf32>
      %c0_128 = arith.constant 0 : index
      %c0_129 = arith.constant 0 : index
      %c0_130 = arith.constant 0 : index
      %134 = vector.load %arg4[%c0_128, %c0_129, %c0_130] : memref<3x2x128xf32, #tpu.memory_space<vmem>>, vector<3x2x128xf32>
      %cst_131 = arith.constant dense<0.000000e+00> : vector<3x2xf32>
      %135 = vector.multi_reduction <add>, %134, %cst_131 [2] : vector<3x2x128xf32> to vector<3x2xf32>
      %136 = math.sqrt %135 : vector<3x2xf32>
      %c0_132 = arith.constant 0 : index
      %c0_133 = arith.constant 0 : index
      %c0_134 = arith.constant 0 : index
      %137 = vector.load %arg5[%c0_132, %c0_133, %c0_134] : memref<3x2x128xf32, #tpu.memory_space<vmem>>, vector<3x2x128xf32>
      %cst_135 = arith.constant dense<0.000000e+00> : vector<3x2xf32>
      %138 = vector.multi_reduction <add>, %137, %cst_135 [2] : vector<3x2x128xf32> to vector<3x2xf32>
      %139 = math.sqrt %138 : vector<3x2xf32>
      %cst_136 = arith.constant 9.99999993E-9 : f32
      %140 = vector.broadcast %cst_136 : f32 to vector<3x2xf32>
      %141 = arith.maximumf %136, %140 : vector<3x2xf32>
      %cst_137 = arith.constant 9.99999993E-9 : f32
      %142 = vector.broadcast %cst_137 : f32 to vector<3x2xf32>
      %143 = arith.maximumf %139, %142 : vector<3x2xf32>
      %144 = arith.mulf %141, %143 : vector<3x2xf32>
      %145 = arith.divf %133, %144 : vector<3x2xf32>
      %cst_138 = arith.constant 1.000000e+00 : f32
      %146 = vector.broadcast %cst_138 : f32 to vector<3x2xf32>
      %147 = arith.subf %146, %145 : vector<3x2xf32>
      %cst_139 = arith.constant dense<0.000000e+00> : vector<3xf32>
      %148 = vector.multi_reduction <add>, %147, %cst_139 [1] : vector<3x2xf32> to vector<3xf32>
      %149 = vector.shape_cast %148 : vector<3xf32> to vector<3x1xf32>
      %cst_140 = arith.constant dense<0.000000e+00> : vector<1xf32>
      %150 = vector.multi_reduction <add>, %149, %cst_140 [0] : vector<3x1xf32> to vector<1xf32>
      %151 = vector.shape_cast %150 : vector<1xf32> to vector<1x1xf32>
      %c0_141 = arith.constant 0 : index
      %c0_142 = arith.constant 0 : index
      %152 = vector.load %arg2[%c0_141, %c0_142] : memref<1x1xf32, #tpu.memory_space<vmem>>, vector<1x1xf32>
      tpu.vector_store %arg2[%c0_141, %c0_142], %151 {strides = array<i32>} : memref<1x1xf32, #tpu.memory_space<vmem>>, vector<1x1xf32>,
    } else {
    }
    return
  }
  func.func @transform_0(%arg0: i32) -> (i32, i32, i32, i32) {
    %c0_i32 = arith.constant 0 : i32
    %c0_i32_0 = arith.constant 0 : i32
    %c0_i32_1 = arith.constant 0 : i32
    %c0_i32_2 = arith.constant 0 : i32
    return %c0_i32, %c0_i32_0, %c0_i32_1, %arg0 : i32, i32, i32, i32
  }
  func.func @transform_1(%arg0: i32) -> (i32, i32) {
    %c0_i32 = arith.constant 0 : i32
    %c0_i32_0 = arith.constant 0 : i32
    %c0_i32_1 = arith.constant 0 : i32
    return %c0_i32, %c0_i32_0 : i32, i32
  }
}

</mosaic_0001>

<bundles_post_ra>
// kernel: normal_consistency_loss.1
= control target key start
LH: loop header
LB: loop body
LE: loop exit
PB: predicated region body
PF: predicated region fallthrough
CT: control target
= control target key end

     0   :  { %v319_v2 = vmov 0.0   ;;  %s388_s0 = inlined_call_operand.vmem [shape: f32[4,3,2,128], index: 0, kind: input, shape index: {}]   ;;  %s389_s1 = inlined_call_operand.hbm [shape: f32[1,1], index: 1, kind: output, shape index: {}]  }
   0x1   :  { %v265_v0 = vld [vmem:[%s388_s0 + $0x8] sm:$0x3]  ;;  %v266_v1 = vld [vmem:[%s388_s0 + $0x2] sm:$0x3]  ;;  %19 = vst [vmem:[#allocation4] sm:$0x3] %v319_v2 }
   0x2   :  { %v30_v3 = vsub.f32 %v265_v0, %v266_v1  ;;  %v267_v4 = vld [vmem:[%s388_s0 + $0xa] sm:$0x3]  ;;  %v268_v5 = vld [vmem:[%s388_s0 + $0x4] sm:$0x3]  ;;  %v273_v6 = vld [vmem:[%s388_s0 + $0x14] sm:$0x3] }
   0x3   :  { %13 = vst [vmem:[#allocation2] sm:$0x3] %v319_v2  ;;  %14 = vst [vmem:[#allocation2 + $0x2] sm:$0x3] %v319_v2  ;;  %v35_v7 = vsub.f32 %v267_v4, %v268_v5  ;;  %v50_v8 = vsub.f32 %v273_v6, %v266_v1  ;;  %v274_v9 = vld [vmem:[%s388_s0 + $0x16] sm:$0x3] }
   0x4   :  { %15 = vst [vmem:[#allocation2 + $0x4] sm:$0x3] %v319_v2  ;;  %16 = vst [vmem:[#allocation3] sm:$0x3] %v319_v2  ;;  %v270_v10 = vld [vmem:[%s388_s0 + $0xe] sm:$0x3]  ;;  %v53_v12 = vsub.f32 %v274_v9, %v268_v5 }
   0x5   :  { %17 = vst [vmem:[#allocation3 + $0x2] sm:$0x3] %v319_v2  ;;  %18 = vst [vmem:[#allocation3 + $0x4] sm:$0x3] %v319_v2  ;;  %v271_v11 = vld [vmem:[%s388_s0 + $0x10] sm:$0x3]  ;;  %v41_v13 = vsub.f32 %v270_v10, %v266_v1  ;;  %v64_v18 = vmul.f32 %v50_v8, %v35_v7 }
   0x6   :  { %20 = vst [vmem:[#allocation4 + $0x2] sm:$0x3] %v319_v2  ;;  %21 = vst [vmem:[#allocation4 + $0x4] sm:$0x3] %v319_v2  ;;  %v44_v14 = vsub.f32 %v271_v11, %v268_v5  ;;  %v264_v15 = vld [vmem:[%s388_s0 + $0x6] sm:$0x3] }
   0x7   :  { %v24_v16 = vld [vmem:[%s388_s0] sm:$0x3]  ;;  %v272_v17 = vld [vmem:[%s388_s0 + $0x12] sm:$0x3]  ;;  %v269_v21 = vld [vmem:[%s388_s0 + $0xc] sm:$0x3] }
   0x8   :  { %v25_v19 = vsub.f32 %v264_v15, %v24_v16  ;;  %v47_v20 = vsub.f32 %v272_v17, %v24_v16 }
   0x9   :  { %6 = vsyncpa [#allocation6], 0  ;;  %v63_v22 = vmul.f32 %v53_v12, %v30_v3  ;;  %v54_v23 = vmul.f32 %v41_v13, %v35_v7  ;;  %v55_v24 = vmul.f32 %v44_v14, %v30_v3  ;;  %v38_v25 = vsub.f32 %v269_v21, %v24_v16  ;;  %v80_v34 = vld [vmem:[#allocation4] sm:$0x3]  ;;  %s320_s0 = smov [#allocation5]  }
   0xa   :  { %v66_v26 = vmul.f32 %v47_v20, %v35_v7  ;;  %v67_v27 = vmul.f32 %v53_v12, %v25_v19  ;;  %v57_v28 = vmul.f32 %v44_v14, %v25_v19  ;;  %v69_v29 = vmul.f32 %v50_v8, %v25_v19  ;;  %v72_v48 = vld [vmem:[#allocation2] sm:$0x3]  ;;  %v85_v55 = vld [vmem:[#allocation2 + $0x2] sm:$0x3]  ;;  %s256_s30 = sshll.u32 %s320_s0, 4  ;;  %s257_s30 = int_to_ptr.vmem [resolvable:$true] %s256_s30 }
   0xb   :  { %v65_v30 = vsub.f32 %v63_v22, %v64_v18  ;;  %v56_v31 = vsub.f32 %v54_v23, %v55_v24  ;;  %v58_v32 = vmul.f32 %v38_v25, %v35_v7  ;;  %v70_v33 = vmul.f32 %v47_v20, %v30_v3  ;;  %v76_v35 = vld [vmem:[#allocation3] sm:$0x3]  ;;  %v100_v60 = vld [vmem:[#allocation2 + $0x4] sm:$0x3]  ;;  %s295_s2 = scalar_lea.vmem %s257_s30, 16  ;;  %s299_s3 = scalar_lea.vmem %s257_s30, 32 }
   0xc   :  { %v68_v36 = vsub.f32 %v66_v26, %v67_v27  ;;  %v60_v37 = vmul.f32 %v38_v25, %v30_v3  ;;  %v61_v38 = vmul.f32 %v41_v13, %v25_v19  ;;  %v90_v45 = vld [vmem:[#allocation3 + $0x2] sm:$0x3]  ;;  %v105_v54 = vld [vmem:[#allocation3 + $0x4] sm:$0x3]  ;;  %vm120_vm0 = vcmask 1041408   ;;  %p296_p0 = scmp.ne.s32.totalorder %s257_s30, %s295_s2  ;;  %p300_p1 = scmp.lt.s32.totalorder %s257_s30, %s257_s30 }
   0xd   :  { %v81_v39 = vmul.f32 %v65_v30, %v65_v30  ;;  %v77_v40 = vmul.f32 %v56_v31, %v56_v31  ;;  %v95_v41 = vld [vmem:[#allocation4 + $0x2] sm:$0x3]  ;;  %v59_v42 = vsub.f32 %v57_v28, %v58_v32  ;;  %v71_v43 = vsub.f32 %v69_v29, %v70_v33  ;;  %v110_v46 = vld [vmem:[#allocation4 + $0x4] sm:$0x3]  ;;  %p301_p2 = scmp.lt.s32.totalorder %s299_s3, %s295_s2 }
   0xe   :  { %v96_v44 = vmul.f32 %v68_v36, %v68_v36  ;;  %v62_v47 = vsub.f32 %v60_v37, %v61_v38  ;;  %v73_v49 = vmul.f32 %v65_v30, %v56_v31  ;;  %vm231_vm13 = vcmask 1041409  }
   0xf   :  { %v82_v50 = vadd.f32 %v81_v39, %v80_v34  ;;  %v78_v51 = vadd.f32 %v77_v40, %v76_v35  ;;  %v91_v52 = vmul.f32 %v59_v42, %v59_v42  ;;  %v111_v53 = vmul.f32 %v71_v43, %v71_v43  ;;  %p302_p3 = por %p301_p2, %p300_p1 }
  0x10   :  { %v97_v56 = vadd.f32 %v96_v44, %v95_v41  ;;  %v106_v57 = vmul.f32 %v62_v47, %v62_v47  ;;  %v74_v58 = vadd.f32 %v73_v49, %v72_v48  ;;  %v86_v59 = vmul.f32 %v68_v36, %v59_v42 }
  0x11   :  { %83 = vst [vmem:[#allocation4] sm:$0x3] %v82_v50  ;;  %79 = vst [vmem:[#allocation3] sm:$0x3] %v78_v51  ;;  %v92_v61 = vadd.f32 %v91_v52, %v90_v45  ;;  %v112_v62 = vadd.f32 %v111_v53, %v110_v46  ;;  %v101_v63 = vmul.f32 %v71_v43, %v62_v47  ;;  %vm233_vm14 = vcmask 1042434   ;;  %p303_p4 = pnand %p302_p3, %p296_p0 }
  0x12   :  { %98 = vst [vmem:[#allocation4 + $0x2] sm:$0x3] %v97_v56  ;;  %v107_v0 = vadd.f32 %v106_v57, %v105_v54  ;;  %75 = vst [vmem:[#allocation2] sm:$0x3] %v74_v58  ;;  %v87_v1 = vadd.f32 %v86_v59, %v85_v55  ;;  %vm236_vm15 = vcmask 10240  }
  0x13   :  { %93 = vst [vmem:[#allocation3 + $0x2] sm:$0x3] %v92_v61  ;;  %113 = vst [vmem:[#allocation4 + $0x4] sm:$0x3] %v112_v62  ;;  %v102_v2 = vadd.f32 %v101_v63, %v100_v60 }
  0x14   :  { %108 = vst [vmem:[#allocation3 + $0x4] sm:$0x3] %v107_v0  ;;  %88 = vst [vmem:[#allocation2 + $0x2] sm:$0x3] %v87_v1 }
  0x15   :  { %103 = vst [vmem:[#allocation2 + $0x4] sm:$0x3] %v102_v2  ;;  %v217_v2 = vlaneseq }
  0x18   :  { %v163_v3 = vld [vmem:[#allocation4] sm:$0x3]  ;;  %v130_v4 = vld [vmem:[#allocation3] sm:$0x3] }
  0x19   :  { %v166_v5 = vsel %vm120_vm0, %v163_v3, 0.0  ;;  %v133_v6 = vsel %vm120_vm0, %v130_v4, 0.0  ;;  %v164_v7 = vld [vmem:[#allocation4 + $0x2] sm:$0x3]  ;;  %v117_v15 = vld [vmem:[#allocation2] sm:$0x3] }
  0x1a   :  { %167 = vadd.xlane.f32.xlu1 %v166_v5  ;;  %134 = vadd.xlane.f32.xlu0 %v133_v6  ;;  %v131_v8 = vld [vmem:[#allocation3 + $0x2] sm:$0x3]  ;;  %v169_v9 = vsel %vm120_vm0, %v164_v7, 0.0  ;;  %v165_v11 = vld [vmem:[#allocation4 + $0x4] sm:$0x3]  ;;  %v121_v17 = vsel %vm120_vm0, %v117_v15, 0.0 }
  0x1b   :  { %v136_v10 = vsel %vm120_vm0, %v131_v8, 0.0  ;;  %v132_v12 = vld [vmem:[#allocation3 + $0x4] sm:$0x3]  ;;  %v172_v13 = vsel %vm120_vm0, %v165_v11, 0.0  ;;  %v118_v16 = vld [vmem:[#allocation2 + $0x2] sm:$0x3] }
  0x1c   :  { %v139_v14 = vsel %vm120_vm0, %v132_v12, 0.0  ;;  %v124_v18 = vsel %vm120_vm0, %v118_v16, 0.0  ;;  %v119_v19 = vld [vmem:[#allocation2 + $0x4] sm:$0x3]  ;;  %v218_v7 = vand.u32 127, %v217_v2  ;;  %v220_v8 = vshrl.u32 %v217_v2, 7 }
  0x1d   :  { %v127_v20 = vsel %vm120_vm0, %v119_v19, 0.0  ;;  %vm240_vm0 = vcmask 1042432  }
  0x1e   :  { %170 = vadd.xlane.f32.xlu1 %v169_v9  ;;  %137 = vadd.xlane.f32.xlu0 %v136_v10 }
  0x22   :  { %173 = vadd.xlane.f32.xlu1 %v172_v13  ;;  %140 = vadd.xlane.f32.xlu0 %v139_v14  ;;  %v221_v14 = vsub.s32 %v218_v7, %v220_v8 }
  0x26   :  { %122 = vadd.xlane.f32.xlu0 %v121_v17  ;;  %125 = vadd.xlane.f32.xlu1 %v124_v18 }
  0x2a   :  { %128 = vadd.xlane.f32.xlu0 %v127_v20 }
  0xa7   :  { %v168_v21 = vpop.xlane.xlu1 %167  ;;  %v135_v22 = vpop.xlane.xlu0 %134 }
  0xa8   :  { %277 = vrsqrt.f32 %v168_v21  ;;  %vm177_vm1 = vcmp.eq.f32.partialorder %v168_v21, inf  ;;  %v180_v30 = vand.u32 2147483648, %v168_v21  ;;  %vm179_vm2 = vcmp.eq.f32.partialorder %v168_v21, 0.0 }
  0xa9   :  { %279 = vrsqrt.f32 %v135_v22  ;;  %vm144_vm3 = vcmp.eq.f32.partialorder %v135_v22, inf  ;;  %v147_v33 = vand.u32 2147483648, %v135_v22  ;;  %vm146_vm4 = vcmp.eq.f32.partialorder %v135_v22, 0.0 }
  0xab   :  { %v171_v23 = vpop.xlane.xlu1 %170  ;;  %v138_v24 = vpop.xlane.xlu0 %137 }
  0xac   :  { %281 = vrsqrt.f32 %v171_v23  ;;  %vm184_vm5 = vcmp.eq.f32.partialorder %v171_v23, inf  ;;  %v187_v41 = vand.u32 2147483648, %v171_v23  ;;  %vm186_vm6 = vcmp.eq.f32.partialorder %v171_v23, 0.0 }
  0xad   :  { %283 = vrsqrt.f32 %v138_v24  ;;  %vm151_vm7 = vcmp.eq.f32.partialorder %v138_v24, inf  ;;  %v154_v45 = vand.u32 2147483648, %v138_v24  ;;  %vm153_vm8 = vcmp.eq.f32.partialorder %v138_v24, 0.0 }
  0xaf   :  { %v174_v25 = vpop.xlane.xlu1 %173  ;;  %v141_v26 = vpop.xlane.xlu0 %140 }
  0xb0   :  { %285 = vrsqrt.f32 %v174_v25  ;;  %vm191_vm9 = vcmp.eq.f32.partialorder %v174_v25, inf  ;;  %vm193_vm10 = vcmp.eq.f32.partialorder %v174_v25, 0.0  ;;  %v194_v54 = vand.u32 2147483648, %v174_v25 }
  0xb1   :  { %287 = vrsqrt.f32 %v141_v26  ;;  %vm158_vm11 = vcmp.eq.f32.partialorder %v141_v26, inf  ;;  %v161_v58 = vand.u32 2147483648, %v141_v26  ;;  %vm160_vm12 = vcmp.eq.f32.partialorder %v141_v26, 0.0 }
  0xb2   :  { %v278_v27 = vpop.eup %277 }
  0xb3   :  { %v280_v28 = vpop.eup %279  ;;  %v176_v29 = vmul.f32 %v278_v27, %v168_v21  ;;  %v123_v4 = vpop.xlane.xlu0 %122 }
  0xb4   :  { %v143_v31 = vmul.f32 %v280_v28, %v135_v22  ;;  %v126_v5 = vpop.xlane.xlu1 %125 }
  0xb5   :  { %v178_v32 = vsel %vm177_vm1, %v168_v21, %v176_v29  ;;  %vm248_vm1 = vcmask 0  }
  0xb6   :  { %v282_v34 = vpop.eup %281  ;;  %v181_v35 = vsel %vm179_vm2, %v180_v30, %v178_v32  ;;  %v145_v36 = vsel %vm144_vm3, %v135_v22, %v143_v31 }
  0xb7   :  { %v284_v37 = vpop.eup %283  ;;  %v148_v38 = vsel %vm146_vm4, %v147_v33, %v145_v36  ;;  %v183_v39 = vmul.f32 %v282_v34, %v171_v23  ;;  %v199_v40 = vmax.f32 %v181_v35, 1e-08  ;;  %v129_v11 = vpop.xlane.xlu0 %128 }
  0xb8   :  { %v150_v42 = vmul.f32 %v284_v37, %v138_v24  ;;  %v196_v43 = vmax.f32 %v148_v38, 1e-08 }
  0xb9   :  { %v185_v44 = vsel %vm184_vm5, %v171_v23, %v183_v39 }
  0xba   :  { %v286_v46 = vpop.eup %285  ;;  %v188_v47 = vsel %vm186_vm6, %v187_v41, %v185_v44  ;;  %v152_v48 = vsel %vm151_vm7, %v138_v24, %v150_v42  ;;  %v202_v49 = vmul.f32 %v199_v40, %v196_v43 }
  0xbb   :  { %v288_v50 = vpop.eup %287  ;;  %v155_v51 = vsel %vm153_vm8, %v154_v45, %v152_v48  ;;  %v190_v52 = vmul.f32 %v286_v46, %v174_v25  ;;  %v200_v53 = vmax.f32 %v188_v47, 1e-08 }
  0xbc   :  { %v157_v55 = vmul.f32 %v288_v50, %v141_v26  ;;  %v197_v56 = vmax.f32 %v155_v51, 1e-08  ;;  %289 = vrcp.f32 %v202_v49 }
  0xbd   :  { %v192_v57 = vsel %vm191_vm9, %v174_v25, %v190_v52 }
  0xbe   :  { %v195_v59 = vsel %vm193_vm10, %v194_v54, %v192_v57  ;;  %v159_v60 = vsel %vm158_vm11, %v141_v26, %v157_v55  ;;  %v203_v61 = vmul.f32 %v200_v53, %v197_v56 }
  0xbf   :  { %v162_v62 = vsel %vm160_vm12, %v161_v58, %v159_v60  ;;  %v201_v63 = vmax.f32 %v195_v59, 1e-08 }
  0xc0   :  { %291 = vrcp.f32 %v203_v61  ;;  %v198_v0 = vmax.f32 %v162_v62, 1e-08 }
  0xc2   :  { %v204_v1 = vmul.f32 %v201_v63, %v198_v0 }
  0xc4   :  { %293 = vrcp.f32 %v204_v1 }
  0xc6   :  { %v290_v3 = vpop.eup %289 }
  0xc7   :  { %v206_v9 = vmul.f32 %v290_v3, %v123_v4 }
  0xc9   :  { %v211_v15 = vsub.f32 1.0, %v206_v9 }
  0xca   :  { %v292_v6 = vpop.eup %291 }
  0xcb   :  { %v208_v10 = vmul.f32 %v292_v6, %v126_v5  ;;  %v222_v19 = vrot.slane %v211_v15, %v221_v14 }
  0xcd   :  { %v212_v12 = vsub.f32 1.0, %v208_v10 }
  0xce   :  { %v294_v13 = vpop.eup %293 }
  0xcf   :  { %v210_v16 = vmul.f32 %v294_v13, %v129_v11  ;;  %v226_v17 = vrot.slane %v212_v12, %v221_v14 }
  0xd1   :  { %v213_v18 = vsub.f32 1.0, %v210_v16  ;;  %v232_v21 = vsel %vm231_vm13, %v226_v17, %v222_v19 }
  0xd3   :  { %v230_v20 = vrot.slane %v213_v18, %v221_v14 }
  0xd5   :  { %v234_v22 = vsel %vm233_vm14, %v230_v20, %v232_v21 }
  0xd6   :  { %v237_v23 = vsel %vm236_vm15, %v234_v22, 0.0 }
  0xd7   :  { %238 = vadd.xlane.f32.xlu1 %v237_v23 }
 0x164   :  { %v239_v24 = vpop.xlane.xlu1 %238 }
 0x165   :  { %v241_v25 = vsel %vm240_vm0, %v239_v24, 0.0 }
 0x166   :  { %v242_v26 = vrot.slane %v241_v25, 4 }
 0x168   :  { %v243_v27 = vadd.f32 %v242_v26, %v241_v25 }
 0x16a   :  { %v244_v28 = vrot.slane %v243_v27, 2 }
 0x16c   :  { %v245_v29 = vadd.f32 %v244_v28, %v243_v27 }
 0x16e   :  { %v246_v30 = vrot.slane %v245_v29, 1 }
 0x170   :  { %v247_v31 = vadd.f32 %v246_v30, %v245_v29 }
 0x172   :  { %249 = vst.msk [vmem:[#allocation5] sm:$0x1] %vm248_vm1, %v247_v31 }
 0x173   :  { %306 = shalt.err (!%p303_p4)
}
 0x174   :  { %s307_s6 = scalar_lea.hbm %s389_s1, 16 }
 0x175   :  { %p308_p5 = scmp.ne.s32.totalorder %s389_s1, %s307_s6  ;;  %p311_p6 = scmp.lt.u32.totalorder %s307_s6, %s389_s1 }
 0x177   :  { %p313_p7 = pnand %p311_p6, %p308_p5 }
 0x179   :  { %316 = shalt.err (!%p313_p7)
}
 0x17a   :  { %259 = dma.vmem_to_hbm [thread:$0]  %s257_s30, 16, %s389_s1, [#allocation6]  }
 0x17b   :  { %317 = dma.done.wait [#allocation6], 16  }
 0x17c   :  { %318 = vsyncadd [#allocation6], 4294967280 }
 0x17d   :  { %263 = vsyncpa [#allocation6], 1 }

</bundles_post_ra>
